<compile_context>
chip_gen: v7x
topology: tpu7x:2x2x1
jax: 0.10.0
libtpu: 0.0.40
codegen_flags: <defaults>
</compile_context>

<pallas_src>
import numpy as np
import jax
import jax.numpy as jnp
from jax.experimental import pallas as pl
from jax.experimental.pallas import tpu as pltpu

# --- scaled-down hyperparameters (structurally identical to the original module:
#     input_dim=128, kernel_size=4, stride=2, latent_dim=1024) ---
INPUT_DIM = 16
KERNEL_SIZE = 4
STRIDE = 2
LATENT_DIM = 32
IN_CH = 3
ENC_CH = 32

CONV_OUT = (INPUT_DIM - KERNEL_SIZE) // STRIDE + 1      # 7   (original: 63)
FEAT = CONV_OUT * CONV_OUT                              # 49  (original: 3969)
CKK = IN_CH * KERNEL_SIZE * KERNEL_SIZE                 # 48
NTAP = KERNEL_SIZE // STRIDE                            # 2 kernel taps per output dim
NPHASE = STRIDE                                         # 2 output phases per dim
DEC_OUT = (CONV_OUT - 1) * STRIDE + KERNEL_SIZE         # 16  (original: 128)
Q = DEC_OUT // NPHASE                                   # 8 per-phase output size
DEC_ROWS = IN_CH * NPHASE * NPHASE                      # 12 = (out_ch, phase) rows
assert DEC_OUT == NPHASE * Q and DEC_OUT == INPUT_DIM


def _decoder_gather_mats():
    """G[t, iy*W+ix, q*Q+r] = 1 iff (iy, ix) == (q-dh, r-dw) lies inside the z feature map.

    Tap t = dh*NTAP + dw. Multiplying a (C, FEAT) feature map by G[t] produces the tap-shifted
    (C, Q*Q) map with zero-filled borders -- this replaces the zero-dilated im2col."""
    g = np.zeros((NTAP * NTAP, FEAT, Q * Q), np.float32)
    for dh in range(NTAP):
        for dw in range(NTAP):
            t = dh * NTAP + dw
            for q in range(Q):
                iy = q - dh
                if not (0 <= iy < CONV_OUT):
                    continue
                for r in range(Q):
                    ix = r - dw
                    if 0 <= ix < CONV_OUT:
                        g[t, iy * CONV_OUT + ix, q * Q + r] = 1.0
    return g


_G_TAPS = _decoder_gather_mats()                        # (4, FEAT, Q*Q), 0/1 constants


# ----------------------------- fused Pallas kernel -----------------------------

def _vae_fused_kernel(col_ref, w1_ref, b1_ref, w21_ref, b21_ref, w22_ref, b22_ref,
                      w3_ref, b3_ref, wdec_ref, bdec_ref, g_ref, eps_ref,
                      recon_ref, mu_ref, logvar_ref):
    f32 = jnp.float32

    # ---- encoder: Conv2d(3, 32, 4, 2) as (32,48)@(48,FEAT) + bias, sigmoid ----
    h = jnp.dot(w1_ref[...], col_ref[0], preferred_element_type=f32)
    h = jax.nn.sigmoid(h + b1_ref[...])                                # (32, FEAT)

    # ---- fc21 / fc22 + reparameterize: z = eps * exp(0.5*logvar) + mu ----
    mu = jnp.dot(h, w21_ref[...], preferred_element_type=f32) + b21_ref[...]   # (32, L)
    lv = jnp.dot(h, w22_ref[...], preferred_element_type=f32) + b22_ref[...]   # (32, L)
    z = eps_ref[0] * jnp.exp(0.5 * lv) + mu                                    # (32, L)

    # ---- fc3 + relu (stays resident in VMEM; never written to HBM) ----
    z3 = jnp.dot(z, w3_ref[...], preferred_element_type=f32) + b3_ref[...]
    z3 = jnp.maximum(z3, 0.0)                                          # (32, FEAT)

    # ---- decoder: ConvTranspose2d(32, 3, 4, 2) + sigmoid, phase-decomposed ----
    # out[co, 2q+rh, 2r+rw] = b4[co] + sum_{ci,dh,dw} W[ci,co,rh+2dh,rw+2dw] * z3[ci, q-dh, r-dw]
    # Per tap t=(dh,dw): weights (12,32) @ z3 (32,FEAT), then a 0/1 gather matmul (FEAT, Q*Q)
    # shifts the map and zero-fills the border. No zero-dilated image is ever materialized.
    acc = jnp.zeros((DEC_ROWS, Q * Q), f32)
    for t in range(NTAP * NTAP):
        y = jnp.dot(wdec_ref[t], z3, preferred_element_type=f32)       # (12, FEAT)
        acc = acc + jnp.dot(y, g_ref[t], preferred_element_type=f32)   # (12, Q*Q)
    recon_ref[0] = jax.nn.sigmoid(acc + bdec_ref[...]).astype(recon_ref.dtype)

    mu_ref[0] = mu.astype(mu_ref.dtype)
    logvar_ref[0] = lv.astype(logvar_ref.dtype)


def _const(shape):
    ndim = len(shape)
    return pl.BlockSpec(shape, lambda b, _n=ndim: (0,) * _n)


def _batched(shape_tail):
    ntail = len(shape_tail)
    return pl.BlockSpec((1,) + tuple(shape_tail), lambda b, _n=ntail: (b,) + (0,) * _n)


def _fused_forward(col, w1m, b1c, w21t, b21r, w22t, b22r, w3t, b3r, wdec, bdec, g, eps):
    B = col.shape[0]
    out_shape = (
        jax.ShapeDtypeStruct((B, DEC_ROWS, Q * Q), jnp.float32),       # phase-ordered recon
        jax.ShapeDtypeStruct((B, ENC_CH, LATENT_DIM), jnp.float32),    # mu
        jax.ShapeDtypeStruct((B, ENC_CH, LATENT_DIM), jnp.float32),    # logvar
    )
    in_specs = [
        _batched((CKK, FEAT)),                      # col
        _const((ENC_CH, CKK)),                      # conv weight (32, 48)
        _const((ENC_CH, 1)),                        # conv bias (column)
        _const((FEAT, LATENT_DIM)),                 # w21^T
        _const((1, LATENT_DIM)),                    # b21 (row)
        _const((FEAT, LATENT_DIM)),                 # w22^T
        _const((1, LATENT_DIM)),                    # b22
        _const((LATENT_DIM, FEAT)),                 # w3^T
        _const((1, FEAT)),                          # b3
        _const((NTAP * NTAP, DEC_ROWS, ENC_CH)),    # decoder tap weights
        _const((DEC_ROWS, 1)),                      # decoder bias (column)
        _const((NTAP * NTAP, FEAT, Q * Q)),         # 0/1 gather matrices
        _batched((ENC_CH, LATENT_DIM)),             # eps
    ]
    out_specs = (
        _batched((DEC_ROWS, Q * Q)),
        _batched((ENC_CH, LATENT_DIM)),
        _batched((ENC_CH, LATENT_DIM)),
    )
    return pl.pallas_call(
        _vae_fused_kernel,
        grid=(B,),
        in_specs=in_specs,
        out_specs=out_specs,
        out_shape=out_shape,
        compiler_params=pltpu.CompilerParams(dimension_semantics=("parallel",)),
    )(col, w1m, b1c, w21t, b21r, w22t, b22r, w3t, b3r, wdec, bdec, g, eps)


# ------------------------------- JAX glue ---------------------------------

def _im2col_T(x, k, stride):
    """NCHW -> (B, C*k*k, OH*OW); row order = (ci, kh, kw). No transpose needed."""
    b, c, hh, ww = x.shape
    oh = (hh - k) // stride + 1
    ow = (ww - k) // stride + 1
    taps = []
    for kh in range(k):
        for kw in range(k):
            taps.append(x[:, :, kh:kh + stride * oh:stride, kw:kw + stride * ow:stride])
    col = jnp.stack(taps, axis=2)                    # (B, C, k*k, OH, OW)
    return col.reshape(b, c * k * k, oh * ow)


def init_params(key):
    """Deterministic PyTorch-default-style (uniform +-1/sqrt(fan_in)) init."""
    ks = jax.random.split(key, 10)
    kk = KERNEL_SIZE * KERNEL_SIZE

    def u(k_, shape, fan_in):
        bound = 1.0 / jnp.sqrt(jnp.float32(fan_in))
        return jax.random.uniform(k_, shape, jnp.float32, -bound, bound)

    return dict(
        w1=u(ks[0], (ENC_CH, IN_CH, KERNEL_SIZE, KERNEL_SIZE), IN_CH * kk),   # Conv2d
        b1=u(ks[1], (ENC_CH,), IN_CH * kk),
        w21=u(ks[2], (LATENT_DIM, FEAT), FEAT),                               # Linear (out,in)
        b21=u(ks[3], (LATENT_DIM,), FEAT),
        w22=u(ks[4], (LATENT_DIM, FEAT), FEAT),
        b22=u(ks[5], (LATENT_DIM,), FEAT),
        w3=u(ks[6], (FEAT, LATENT_DIM), LATENT_DIM),
        b3=u(ks[7], (FEAT,), LATENT_DIM),
        w4=u(ks[8], (ENC_CH, IN_CH, KERNEL_SIZE, KERNEL_SIZE), ENC_CH * kk),  # ConvTranspose2d
        b4=u(ks[9], (IN_CH,), ENC_CH * kk),
    )


def vae_forward(params, x, eps_key):
    B = x.shape[0]

    # --- light glue: encoder im2col (already in kernel layout) + weight packing ---
    col = _im2col_T(x, KERNEL_SIZE, STRIDE)                             # (B, CKK, FEAT)
    w1m = params["w1"].reshape(ENC_CH, CKK)                             # rows=co, cols=(ci,kh,kw)
    b1c = params["b1"].reshape(ENC_CH, 1)

    # ConvTranspose2d weight (in=32, out=3, k, k) -> per-tap phase matrices:
    # wdec[t, co*4 + (rh*2+rw), ci] = W[ci, co, rh + 2*dh, rw + 2*dw],  t = dh*2 + dw
    w4r = params["w4"].reshape(ENC_CH, IN_CH, NTAP, NPHASE, NTAP, NPHASE)   # ci,co,dh,rh,dw,rw
    wdec = w4r.transpose(2, 4, 1, 3, 5, 0).reshape(NTAP * NTAP, DEC_ROWS, ENC_CH)
    bdec = jnp.repeat(params["b4"], NPHASE * NPHASE).reshape(DEC_ROWS, 1)

    # TODO(synk): eps could be drawn in-kernel (pltpu.prng_seed + pltpu.prng_random_bits) to
    # drop this input DMA, but a normal sample needs Box-Muller's cos(), which has no
    # guaranteed Mosaic lowering -- keep the exact N(0,1) draw in the wrapper.
    eps = jax.random.normal(eps_key, (B, ENC_CH, LATENT_DIM), jnp.float32)

    recon_ph, mu, logvar = _fused_forward(
        col, w1m, b1c,
        params["w21"].T, params["b21"].reshape(1, LATENT_DIM),
        params["w22"].T, params["b22"].reshape(1, LATENT_DIM),
        params["w3"].T, params["b3"].reshape(1, FEAT),
        wdec, bdec, jnp.asarray(_G_TAPS), eps)

    # --- de-phase decoder output once: (B, co*4+p, q*Q+r) -> (B, 3, 2q+rh, 2r+rw) ---
    rec = recon_ph.reshape(B, IN_CH, NPHASE, NPHASE, Q, Q)              # b, co, rh, rw, q, r
    recon = rec.transpose(0, 1, 4, 2, 5, 3).reshape(B, IN_CH, DEC_OUT, DEC_OUT)

    return (recon,
            mu.reshape(B, ENC_CH, 1, LATENT_DIM),
            logvar.reshape(B, ENC_CH, 1, LATENT_DIM))


# --------------------------- pure-XLA reference ----------------------------

def _reference_forward(params, x, eps):
    dn = ("NCHW", "OIHW", "NCHW")
    B = x.shape[0]
    h = jax.lax.conv_general_dilated(x, params["w1"], (STRIDE, STRIDE), "VALID",
                                     dimension_numbers=dn)
    h = jax.nn.sigmoid(h + params["b1"].reshape(1, ENC_CH, 1, 1))
    h = h.reshape(B, ENC_CH, 1, FEAT)
    mu = h @ params["w21"].T + params["b21"]
    logvar = h @ params["w22"].T + params["b22"]
    z = eps.reshape(mu.shape) * jnp.exp(0.5 * logvar) + mu
    z = jnp.maximum(z @ params["w3"].T + params["b3"], 0.0)
    z = z.reshape(B, ENC_CH, CONV_OUT, CONV_OUT)
    # ConvTranspose2d == lhs-dilate by stride, pad k-1, correlate with flipped/IO-swapped kernel
    wt = jnp.flip(params["w4"], (2, 3)).transpose(1, 0, 2, 3)
    pad = KERNEL_SIZE - 1
    y = jax.lax.conv_general_dilated(z, wt, (1, 1), ((pad, pad), (pad, pad)),
                                     lhs_dilation=(STRIDE, STRIDE), dimension_numbers=dn)
    recon = jax.nn.sigmoid(y + params["b4"].reshape(1, IN_CH, 1, 1))
    return recon, mu, logvar


if __name__ == "__main__":
    key = jax.random.PRNGKey(0)
    pkey, xkey, ekey = jax.random.split(key, 3)
    params = init_params(pkey)

    B = 2
    x = jax.random.normal(xkey, (B, IN_CH, INPUT_DIM, INPUT_DIM), jnp.float32)

    recon, mu, logvar = jax.jit(vae_forward)(params, x, ekey)
    jax.block_until_ready((recon, mu, logvar))

    assert recon.shape == (B, IN_CH, INPUT_DIM, INPUT_DIM)
    assert mu.shape == (B, ENC_CH, 1, LATENT_DIM)
    assert logvar.shape == (B, ENC_CH, 1, LATENT_DIM)
    assert bool(jnp.all(jnp.isfinite(recon)))

    # Structural sanity check vs. pure-XLA reference (same eps). Loose tolerance: MXU matmuls
    # at DEFAULT precision are ~bf16-rounded while XLA convs may use a different pass count;
    # any indexing/phase/gather bug would show errors >> 1e-1.
    eps = jax.random.normal(ekey, (B, ENC_CH, LATENT_DIM), jnp.float32)
    r_ref, mu_ref, lv_ref = _reference_forward(params, x, eps)
    assert float(jnp.max(jnp.abs(recon - r_ref))) < 2e-2
    assert float(jnp.max(jnp.abs(mu - mu_ref))) < 2e-2
    assert float(jnp.max(jnp.abs(logvar - lv_ref))) < 2e-2

    print("KERNEL_OK")
</pallas_src>

<mosaic_0001>
module attributes {stable_mosaic.version = 11 : i64} {
  func.func @_vae_fused_kernel(%arg0: i32, %arg1: memref<1x48x49xf32, #tpu.memory_space<vmem>>, %arg2: memref<32x48xf32, #tpu.memory_space<vmem>>, %arg3: memref<32x1xf32, #tpu.memory_space<vmem>>, %arg4: memref<49x32xf32, #tpu.memory_space<vmem>>, %arg5: memref<1x32xf32, #tpu.memory_space<vmem>>, %arg6: memref<49x32xf32, #tpu.memory_space<vmem>>, %arg7: memref<1x32xf32, #tpu.memory_space<vmem>>, %arg8: memref<32x49xf32, #tpu.memory_space<vmem>>, %arg9: memref<1x49xf32, #tpu.memory_space<vmem>>, %arg10: memref<4x12x32xf32, #tpu.memory_space<vmem>>, %arg11: memref<12x1xf32, #tpu.memory_space<vmem>>, %arg12: memref<4x49x64xf32, #tpu.memory_space<vmem>>, %arg13: memref<1x32x32xf32, #tpu.memory_space<vmem>>, %arg14: memref<1x12x64xf32, #tpu.memory_space<vmem>>, %arg15: memref<1x32x32xf32, #tpu.memory_space<vmem>>, %arg16: memref<1x32x32xf32, #tpu.memory_space<vmem>>) attributes {dimension_semantics = [#tpu.dimension_semantics<parallel>], iteration_bounds = array<i64: 2>, scalar_prefetch = 0 : i64, scratch_operands = 0 : i64, tpu.core_type = #tpu.core_type<tc>, window_params = [{transform_indices = @transform_0, window_bounds = array<i64: 1, 48, 49>}, {pipeline_mode = #tpu.pipeline_mode<synchronous>, transform_indices = @transform_1, window_bounds = array<i64: 32, 48>}, {pipeline_mode = #tpu.pipeline_mode<synchronous>, transform_indices = @transform_2, window_bounds = array<i64: 32, 1>}, {pipeline_mode = #tpu.pipeline_mode<synchronous>, transform_indices = @transform_3, window_bounds = array<i64: 49, 32>}, {pipeline_mode = #tpu.pipeline_mode<synchronous>, transform_indices = @transform_4, window_bounds = array<i64: 1, 32>}, {pipeline_mode = #tpu.pipeline_mode<synchronous>, transform_indices = @transform_5, window_bounds = array<i64: 49, 32>}, {pipeline_mode = #tpu.pipeline_mode<synchronous>, transform_indices = @transform_6, window_bounds = array<i64: 1, 32>}, {pipeline_mode = #tpu.pipeline_mode<synchronous>, transform_indices = @transform_7, window_bounds = array<i64: 32, 49>}, {pipeline_mode = #tpu.pipeline_mode<synchronous>, transform_indices = @transform_8, window_bounds = array<i64: 1, 49>}, {pipeline_mode = #tpu.pipeline_mode<synchronous>, transform_indices = @transform_9, window_bounds = array<i64: 4, 12, 32>}, {pipeline_mode = #tpu.pipeline_mode<synchronous>, transform_indices = @transform_10, window_bounds = array<i64: 12, 1>}, {pipeline_mode = #tpu.pipeline_mode<synchronous>, transform_indices = @transform_11, window_bounds = array<i64: 4, 49, 64>}, {transform_indices = @transform_12, window_bounds = array<i64: 1, 32, 32>}, {transform_indices = @transform_13, window_bounds = array<i64: 1, 12, 64>}, {transform_indices = @transform_14, window_bounds = array<i64: 1, 32, 32>}, {transform_indices = @transform_15, window_bounds = array<i64: 1, 32, 32>}]} {
    %c0 = arith.constant 0 : index
    %c0_0 = arith.constant 0 : index
    %0 = vector.load %arg2[%c0, %c0_0] : memref<32x48xf32, #tpu.memory_space<vmem>>, vector<32x48xf32>
    %c0_1 = arith.constant 0 : index
    %c0_2 = arith.constant 0 : index
    %c0_3 = arith.constant 0 : index
    %1 = vector.load %arg1[%c0_1, %c0_2, %c0_3] : memref<1x48x49xf32, #tpu.memory_space<vmem>>, vector<1x48x49xf32>
    %2 = vector.shape_cast %1 : vector<1x48x49xf32> to vector<48x49xf32>
    %cst = arith.constant dense<0.000000e+00> : vector<32x49xf32>
    %3 = tpu.matmul %0, %2, %cst {dimension_numbers = #tpu.dot_dimension_numbers<[1], [0], [0], [1], [0, 0, 1, 1], [], []>} : vector<32x48xf32>, vector<48x49xf32>, vector<32x49xf32> -> vector<32x49xf32>
    %c0_4 = arith.constant 0 : index
    %c0_5 = arith.constant 0 : index
    %4 = vector.load %arg3[%c0_4, %c0_5] : memref<32x1xf32, #tpu.memory_space<vmem>>, vector<32x1xf32>
    %5 = vector.broadcast %4 : vector<32x1xf32> to vector<32x49xf32>
    %6 = arith.addf %3, %5 : vector<32x49xf32>
    %7 = arith.negf %6 : vector<32x49xf32>
    %8 = math.exp %7 : vector<32x49xf32>
    %cst_6 = arith.constant 1.000000e+00 : f32
    %9 = vector.broadcast %cst_6 : f32 to vector<32x49xf32>
    %10 = arith.addf %9, %8 : vector<32x49xf32>
    %11 = arith.divf %9, %10 : vector<32x49xf32>
    %c0_7 = arith.constant 0 : index
    %c0_8 = arith.constant 0 : index
    %12 = vector.load %arg4[%c0_7, %c0_8] : memref<49x32xf32, #tpu.memory_space<vmem>>, vector<49x32xf32>
    %cst_9 = arith.constant dense<0.000000e+00> : vector<32x32xf32>
    %13 = tpu.matmul %11, %12, %cst_9 {dimension_numbers = #tpu.dot_dimension_numbers<[1], [0], [0], [1], [0, 0, 1, 1], [], []>} : vector<32x49xf32>, vector<49x32xf32>, vector<32x32xf32> -> vector<32x32xf32>
    %c0_10 = arith.constant 0 : index
    %c0_11 = arith.constant 0 : index
    %14 = vector.load %arg5[%c0_10, %c0_11] : memref<1x32xf32, #tpu.memory_space<vmem>>, vector<1x32xf32>
    %15 = vector.broadcast %14 : vector<1x32xf32> to vector<32x32xf32>
    %16 = arith.addf %13, %15 : vector<32x32xf32>
    %c0_12 = arith.constant 0 : index
    %c0_13 = arith.constant 0 : index
    %17 = vector.load %arg6[%c0_12, %c0_13] : memref<49x32xf32, #tpu.memory_space<vmem>>, vector<49x32xf32>
    %cst_14 = arith.constant dense<0.000000e+00> : vector<32x32xf32>
    %18 = tpu.matmul %11, %17, %cst_14 {dimension_numbers = #tpu.dot_dimension_numbers<[1], [0], [0], [1], [0, 0, 1, 1], [], []>} : vector<32x49xf32>, vector<49x32xf32>, vector<32x32xf32> -> vector<32x32xf32>
    %c0_15 = arith.constant 0 : index
    %c0_16 = arith.constant 0 : index
    %19 = vector.load %arg7[%c0_15, %c0_16] : memref<1x32xf32, #tpu.memory_space<vmem>>, vector<1x32xf32>
    %20 = vector.broadcast %19 : vector<1x32xf32> to vector<32x32xf32>
    %21 = arith.addf %18, %20 : vector<32x32xf32>
    %c0_17 = arith.constant 0 : index
    %c0_18 = arith.constant 0 : index
    %c0_19 = arith.constant 0 : index
    %22 = vector.load %arg13[%c0_17, %c0_18, %c0_19] : memref<1x32x32xf32, #tpu.memory_space<vmem>>, vector<1x32x32xf32>
    %23 = vector.shape_cast %22 : vector<1x32x32xf32> to vector<32x32xf32>
    %cst_20 = arith.constant 5.000000e-01 : f32
    %24 = vector.broadcast %cst_20 : f32 to vector<32x32xf32>
    %25 = arith.mulf %24, %21 : vector<32x32xf32>
    %26 = math.exp %25 : vector<32x32xf32>
    %27 = arith.mulf %23, %26 : vector<32x32xf32>
    %28 = arith.addf %27, %16 : vector<32x32xf32>
    %c0_21 = arith.constant 0 : index
    %c0_22 = arith.constant 0 : index
    %29 = vector.load %arg8[%c0_21, %c0_22] : memref<32x49xf32, #tpu.memory_space<vmem>>, vector<32x49xf32>
    %cst_23 = arith.constant dense<0.000000e+00> : vector<32x49xf32>
    %30 = tpu.matmul %28, %29, %cst_23 {dimension_numbers = #tpu.dot_dimension_numbers<[1], [0], [0], [1], [0, 0, 1, 1], [], []>} : vector<32x32xf32>, vector<32x49xf32>, vector<32x49xf32> -> vector<32x49xf32>
    %c0_24 = arith.constant 0 : index
    %c0_25 = arith.constant 0 : index
    %31 = vector.load %arg9[%c0_24, %c0_25] : memref<1x49xf32, #tpu.memory_space<vmem>>, vector<1x49xf32>
    %32 = vector.broadcast %31 : vector<1x49xf32> to vector<32x49xf32>
    %33 = arith.addf %30, %32 : vector<32x49xf32>
    %cst_26 = arith.constant 0.000000e+00 : f32
    %34 = vector.broadcast %cst_26 : f32 to vector<32x49xf32>
    %35 = arith.maximumf %33, %34 : vector<32x49xf32>
    %cst_27 = arith.constant 0.000000e+00 : f32
    %36 = vector.broadcast %cst_27 : f32 to vector<12x64xf32>
    %c0_28 = arith.constant 0 : index
    %c0_29 = arith.constant 0 : index
    %c0_30 = arith.constant 0 : index
    %37 = vector.load %arg10[%c0_28, %c0_29, %c0_30] : memref<4x12x32xf32, #tpu.memory_space<vmem>>, vector<1x12x32xf32>
    %38 = vector.shape_cast %37 : vector<1x12x32xf32> to vector<12x32xf32>
    %cst_31 = arith.constant dense<0.000000e+00> : vector<12x49xf32>
    %39 = tpu.matmul %38, %35, %cst_31 {dimension_numbers = #tpu.dot_dimension_numbers<[1], [0], [0], [1], [0, 0, 1, 1], [], []>} : vector<12x32xf32>, vector<32x49xf32>, vector<12x49xf32> -> vector<12x49xf32>
    %c0_32 = arith.constant 0 : index
    %c0_33 = arith.constant 0 : index
    %c0_34 = arith.constant 0 : index
    %40 = vector.load %arg12[%c0_32, %c0_33, %c0_34] : memref<4x49x64xf32, #tpu.memory_space<vmem>>, vector<1x49x64xf32>
    %41 = vector.shape_cast %40 : vector<1x49x64xf32> to vector<49x64xf32>
    %cst_35 = arith.constant dense<0.000000e+00> : vector<12x64xf32>
    %42 = tpu.matmul %39, %41, %cst_35 {dimension_numbers = #tpu.dot_dimension_numbers<[1], [0], [0], [1], [0, 0, 1, 1], [], []>} : vector<12x49xf32>, vector<49x64xf32>, vector<12x64xf32> -> vector<12x64xf32>
    %43 = arith.addf %36, %42 : vector<12x64xf32>
    %c1 = arith.constant 1 : index
    %c0_36 = arith.constant 0 : index
    %c0_37 = arith.constant 0 : index
    %44 = vector.load %arg10[%c1, %c0_36, %c0_37] : memref<4x12x32xf32, #tpu.memory_space<vmem>>, vector<1x12x32xf32>
    %45 = vector.shape_cast %44 : vector<1x12x32xf32> to vector<12x32xf32>
    %cst_38 = arith.constant dense<0.000000e+00> : vector<12x49xf32>
    %46 = tpu.matmul %45, %35, %cst_38 {dimension_numbers = #tpu.dot_dimension_numbers<[1], [0], [0], [1], [0, 0, 1, 1], [], []>} : vector<12x32xf32>, vector<32x49xf32>, vector<12x49xf32> -> vector<12x49xf32>
    %c1_39 = arith.constant 1 : index
    %c0_40 = arith.constant 0 : index
    %c0_41 = arith.constant 0 : index
    %47 = vector.load %arg12[%c1_39, %c0_40, %c0_41] : memref<4x49x64xf32, #tpu.memory_space<vmem>>, vector<1x49x64xf32>
    %48 = vector.shape_cast %47 : vector<1x49x64xf32> to vector<49x64xf32>
    %cst_42 = arith.constant dense<0.000000e+00> : vector<12x64xf32>
    %49 = tpu.matmul %46, %48, %cst_42 {dimension_numbers = #tpu.dot_dimension_numbers<[1], [0], [0], [1], [0, 0, 1, 1], [], []>} : vector<12x49xf32>, vector<49x64xf32>, vector<12x64xf32> -> vector<12x64xf32>
    %50 = arith.addf %43, %49 : vector<12x64xf32>
    %c2 = arith.constant 2 : index
    %c0_43 = arith.constant 0 : index
    %c0_44 = arith.constant 0 : index
    %51 = vector.load %arg10[%c2, %c0_43, %c0_44] : memref<4x12x32xf32, #tpu.memory_space<vmem>>, vector<1x12x32xf32>
    %52 = vector.shape_cast %51 : vector<1x12x32xf32> to vector<12x32xf32>
    %cst_45 = arith.constant dense<0.000000e+00> : vector<12x49xf32>
    %53 = tpu.matmul %52, %35, %cst_45 {dimension_numbers = #tpu.dot_dimension_numbers<[1], [0], [0], [1], [0, 0, 1, 1], [], []>} : vector<12x32xf32>, vector<32x49xf32>, vector<12x49xf32> -> vector<12x49xf32>
    %c2_46 = arith.constant 2 : index
    %c0_47 = arith.constant 0 : index
    %c0_48 = arith.constant 0 : index
    %54 = vector.load %arg12[%c2_46, %c0_47, %c0_48] : memref<4x49x64xf32, #tpu.memory_space<vmem>>, vector<1x49x64xf32>
    %55 = vector.shape_cast %54 : vector<1x49x64xf32> to vector<49x64xf32>
    %cst_49 = arith.constant dense<0.000000e+00> : vector<12x64xf32>
    %56 = tpu.matmul %53, %55, %cst_49 {dimension_numbers = #tpu.dot_dimension_numbers<[1], [0], [0], [1], [0, 0, 1, 1], [], []>} : vector<12x49xf32>, vector<49x64xf32>, vector<12x64xf32> -> vector<12x64xf32>
    %57 = arith.addf %50, %56 : vector<12x64xf32>
    %c3 = arith.constant 3 : index
    %c0_50 = arith.constant 0 : index
    %c0_51 = arith.constant 0 : index
    %58 = vector.load %arg10[%c3, %c0_50, %c0_51] : memref<4x12x32xf32, #tpu.memory_space<vmem>>, vector<1x12x32xf32>
    %59 = vector.shape_cast %58 : vector<1x12x32xf32> to vector<12x32xf32>
    %cst_52 = arith.constant dense<0.000000e+00> : vector<12x49xf32>
    %60 = tpu.matmul %59, %35, %cst_52 {dimension_numbers = #tpu.dot_dimension_numbers<[1], [0], [0], [1], [0, 0, 1, 1], [], []>} : vector<12x32xf32>, vector<32x49xf32>, vector<12x49xf32> -> vector<12x49xf32>
    %c3_53 = arith.constant 3 : index
    %c0_54 = arith.constant 0 : index
    %c0_55 = arith.constant 0 : index
    %61 = vector.load %arg12[%c3_53, %c0_54, %c0_55] : memref<4x49x64xf32, #tpu.memory_space<vmem>>, vector<1x49x64xf32>
    %62 = vector.shape_cast %61 : vector<1x49x64xf32> to vector<49x64xf32>
    %cst_56 = arith.constant dense<0.000000e+00> : vector<12x64xf32>
    %63 = tpu.matmul %60, %62, %cst_56 {dimension_numbers = #tpu.dot_dimension_numbers<[1], [0], [0], [1], [0, 0, 1, 1], [], []>} : vector<12x49xf32>, vector<49x64xf32>, vector<12x64xf32> -> vector<12x64xf32>
    %64 = arith.addf %57, %63 : vector<12x64xf32>
    %c0_57 = arith.constant 0 : index
    %c0_58 = arith.constant 0 : index
    %65 = vector.load %arg11[%c0_57, %c0_58] : memref<12x1xf32, #tpu.memory_space<vmem>>, vector<12x1xf32>
    %66 = vector.broadcast %65 : vector<12x1xf32> to vector<12x64xf32>
    %67 = arith.addf %64, %66 : vector<12x64xf32>
    %68 = arith.negf %67 : vector<12x64xf32>
    %69 = math.exp %68 : vector<12x64xf32>
    %cst_59 = arith.constant 1.000000e+00 : f32
    %70 = vector.broadcast %cst_59 : f32 to vector<12x64xf32>
    %71 = arith.addf %70, %69 : vector<12x64xf32>
    %72 = arith.divf %70, %71 : vector<12x64xf32>
    %c0_60 = arith.constant 0 : index
    %c0_61 = arith.constant 0 : index
    %c0_62 = arith.constant 0 : index
    %73 = vector.load %arg14[%c0_60, %c0_61, %c0_62] : memref<1x12x64xf32, #tpu.memory_space<vmem>>, vector<1x12x64xf32>
    %74 = vector.shape_cast %73 : vector<1x12x64xf32> to vector<12x64xf32>
    %75 = vector.shape_cast %72 : vector<12x64xf32> to vector<1x12x64xf32>
    tpu.vector_store %arg14[%c0_60, %c0_61, %c0_62], %75 {strides = array<i32>} : memref<1x12x64xf32, #tpu.memory_space<vmem>>, vector<1x12x64xf32>,
    %c0_63 = arith.constant 0 : index
    %c0_64 = arith.constant 0 : index
    %c0_65 = arith.constant 0 : index
    %76 = vector.load %arg15[%c0_63, %c0_64, %c0_65] : memref<1x32x32xf32, #tpu.memory_space<vmem>>, vector<1x32x32xf32>
    %77 = vector.shape_cast %76 : vector<1x32x32xf32> to vector<32x32xf32>
    %78 = vector.shape_cast %16 : vector<32x32xf32> to vector<1x32x32xf32>
    tpu.vector_store %arg15[%c0_63, %c0_64, %c0_65], %78 {strides = array<i32>} : memref<1x32x32xf32, #tpu.memory_space<vmem>>, vector<1x32x32xf32>,
    %c0_66 = arith.constant 0 : index
    %c0_67 = arith.constant 0 : index
    %c0_68 = arith.constant 0 : index
    %79 = vector.load %arg16[%c0_66, %c0_67, %c0_68] : memref<1x32x32xf32, #tpu.memory_space<vmem>>, vector<1x32x32xf32>
    %80 = vector.shape_cast %79 : vector<1x32x32xf32> to vector<32x32xf32>
    %81 = vector.shape_cast %21 : vector<32x32xf32> to vector<1x32x32xf32>
    tpu.vector_store %arg16[%c0_66, %c0_67, %c0_68], %81 {strides = array<i32>} : memref<1x32x32xf32, #tpu.memory_space<vmem>>, vector<1x32x32xf32>,
    return
  }
  func.func @transform_0(%arg0: i32) -> (i32, i32, i32) {
    %c0_i32 = arith.constant 0 : i32
    %c0_i32_0 = arith.constant 0 : i32
    %c0_i32_1 = arith.constant 0 : i32
    return %arg0, %c0_i32, %c0_i32_0 : i32, i32, i32
  }
  func.func @transform_1(%arg0: i32) -> (i32, i32) {
    %c0_i32 = arith.constant 0 : i32
    %c0_i32_0 = arith.constant 0 : i32
    %c0_i32_1 = arith.constant 0 : i32
    return %c0_i32, %c0_i32_0 : i32, i32
  }
  func.func @transform_2(%arg0: i32) -> (i32, i32) {
    %c0_i32 = arith.constant 0 : i32
    %c0_i32_0 = arith.constant 0 : i32
    %c0_i32_1 = arith.constant 0 : i32
    return %c0_i32, %c0_i32_0 : i32, i32
  }
  func.func @transform_3(%arg0: i32) -> (i32, i32) {
    %c0_i32 = arith.constant 0 : i32
    %c0_i32_0 = arith.constant 0 : i32
    %c0_i32_1 = arith.constant 0 : i32
    return %c0_i32, %c0_i32_0 : i32, i32
  }
  func.func @transform_4(%arg0: i32) -> (i32, i32) {
    %c0_i32 = arith.constant 0 : i32
    %c0_i32_0 = arith.constant 0 : i32
    %c0_i32_1 = arith.constant 0 : i32
    return %c0_i32, %c0_i32_0 : i32, i32
  }
  func.func @transform_5(%arg0: i32) -> (i32, i32) {
    %c0_i32 = arith.constant 0 : i32
    %c0_i32_0 = arith.constant 0 : i32
    %c0_i32_1 = arith.constant 0 : i32
    return %c0_i32, %c0_i32_0 : i32, i32
  }
  func.func @transform_6(%arg0: i32) -> (i32, i32) {
    %c0_i32 = arith.constant 0 : i32
    %c0_i32_0 = arith.constant 0 : i32
    %c0_i32_1 = arith.constant 0 : i32
    return %c0_i32, %c0_i32_0 : i32, i32
  }
  func.func @transform_7(%arg0: i32) -> (i32, i32) {
    %c0_i32 = arith.constant 0 : i32
    %c0_i32_0 = arith.constant 0 : i32
    %c0_i32_1 = arith.constant 0 : i32
    return %c0_i32, %c0_i32_0 : i32, i32
  }
  func.func @transform_8(%arg0: i32) -> (i32, i32) {
    %c0_i32 = arith.constant 0 : i32
    %c0_i32_0 = arith.constant 0 : i32
    %c0_i32_1 = arith.constant 0 : i32
    return %c0_i32, %c0_i32_0 : i32, i32
  }
  func.func @transform_9(%arg0: i32) -> (i32, i32, i32) {
    %c0_i32 = arith.constant 0 : i32
    %c0_i32_0 = arith.constant 0 : i32
    %c0_i32_1 = arith.constant 0 : i32
    %c0_i32_2 = arith.constant 0 : i32
    return %c0_i32, %c0_i32_0, %c0_i32_1 : i32, i32, i32
  }
  func.func @transform_10(%arg0: i32) -> (i32, i32) {
    %c0_i32 = arith.constant 0 : i32
    %c0_i32_0 = arith.constant 0 : i32
    %c0_i32_1 = arith.constant 0 : i32
    return %c0_i32, %c0_i32_0 : i32, i32
  }
  func.func @transform_11(%arg0: i32) -> (i32, i32, i32) {
    %c0_i32 = arith.constant 0 : i32
    %c0_i32_0 = arith.constant 0 : i32
    %c0_i32_1 = arith.constant 0 : i32
    %c0_i32_2 = arith.constant 0 : i32
    return %c0_i32, %c0_i32_0, %c0_i32_1 : i32, i32, i32
  }
  func.func @transform_12(%arg0: i32) -> (i32, i32, i32) {
    %c0_i32 = arith.constant 0 : i32
    %c0_i32_0 = arith.constant 0 : i32
    %c0_i32_1 = arith.constant 0 : i32
    return %arg0, %c0_i32, %c0_i32_0 : i32, i32, i32
  }
  func.func @transform_13(%arg0: i32) -> (i32, i32, i32) {
    %c0_i32 = arith.constant 0 : i32
    %c0_i32_0 = arith.constant 0 : i32
    %c0_i32_1 = arith.constant 0 : i32
    return %arg0, %c0_i32, %c0_i32_0 : i32, i32, i32
  }
  func.func @transform_14(%arg0: i32) -> (i32, i32, i32) {
    %c0_i32 = arith.constant 0 : i32
    %c0_i32_0 = arith.constant 0 : i32
    %c0_i32_1 = arith.constant 0 : i32
    return %arg0, %c0_i32, %c0_i32_0 : i32, i32, i32
  }
  func.func @transform_15(%arg0: i32) -> (i32, i32, i32) {
    %c0_i32 = arith.constant 0 : i32
    %c0_i32_0 = arith.constant 0 : i32
    %c0_i32_1 = arith.constant 0 : i32
    return %arg0, %c0_i32, %c0_i32_0 : i32, i32, i32
  }
}

</mosaic_0001>

<bundles_post_ra>
// kernel: vae_forward.1
= control target key start
LH: loop header
LB: loop body
LE: loop exit
PB: predicated region body
PF: predicated region fallthrough
CT: control target
= control target key end

     0   :  { %s3160_s0 = inlined_call_operand.vmem [shape: f32[2,48,49], index: 0, kind: input, shape index: {}]   ;;  %s3161_s1 = inlined_call_operand.vmem [shape: f32[32,48], index: 1, kind: input, shape index: {}]   ;;  %s3162_s2 = inlined_call_operand.vmem [shape: f32[32,1], index: 2, kind: input, shape index: {}]   ;;  %s3163_s3 = inlined_call_operand.vmem [shape: f32[49,32], index: 3, kind: input, shape index: {}]   ;;  %s3164_s4 = inlined_call_operand.vmem [shape: f32[1,32], index: 4, kind: input, shape index: {}]   ;;  %s3165_s5 = inlined_call_operand.vmem [shape: f32[49,32], index: 5, kind: input, shape index: {}]   ;;  %s3166_s6 = inlined_call_operand.vmem [shape: f32[1,32], index: 6, kind: input, shape index: {}]   ;;  %s3167_s7 = inlined_call_operand.vmem [shape: f32[32,49], index: 7, kind: input, shape index: {}]   ;;  %s3168_s8 = inlined_call_operand.vmem [shape: f32[1,49], index: 8, kind: input, shape index: {}]   ;;  %s3169_s9 = inlined_call_operand.vmem [shape: f32[4,12,32], index: 9, kind: input, shape index: {}]   ;;  %s3170_s10 = inlined_call_operand.vmem [shape: f32[12,1], index: 10, kind: input, shape index: {}]   ;;  %s3171_s11 = inlined_call_operand.vmem [shape: f32[4,49,64], index: 11, kind: input, shape index: {}]   ;;  %s3172_s12 = inlined_call_operand.vmem [shape: f32[2,32,32], index: 12, kind: input, shape index: {}]   ;;  %s3173_s13 = inlined_call_operand.vmem [shape: f32[2,12,64], index: 13, kind: output, shape index: {0}]   ;;  %s3174_s14 = inlined_call_operand.hbm [shape: f32[2,32,32], index: 14, kind: output, shape index: {1}]   ;;  %s3175_s15 = inlined_call_operand.hbm [shape: f32[2,32,32], index: 15, kind: output, shape index: {2}]  }
   0x1   :  { %3182 = sst [smem:[#allocation14_spill]] %s3160_s0 }
   0x2   :  { %3183 = sst [smem:[#allocation15_spill]] %s3161_s1 }
   0x3   :  { %3184 = sst [smem:[#allocation16_spill]] %s3173_s13 }
   0x4   :  { %21 = vsyncpa [#allocation3], 0 }
   0x5   :  { %23 = vsyncpa [#allocation3 + $0x1], 0 }
   0x6   :  { %24 = vsyncpa [#allocation5], 0 }
   0x7   :  { %26 = vsyncpa [#allocation5 + $0x1], 0  ;;  %s2739_s18 = smov 0   ;;  %s2741_s19 = smov 0  }
   0x8   :  { %s2743_s20 = smov 0   ;;  %s2745_s21 = smov 0  }
   0x9 LB: > { %3185 = sst [smem:[#allocation8_spill]] %s2640_s18  ;;  %s2760_s22 = sadd.s32 4294967295, %s2652_s21   ;;  %s2652_s21 = sphi %s2745_s21, %s3199_s21   ;;  %s2648_s20 = sphi %s2743_s20, %s3201_s20   ;;  %s2644_s19 = sphi %s2741_s19, %s3203_s19   ;;  %s2640_s18 = sphi %s2739_s18, %s3202_s18  }
   0xa   : > { %3186 = sst [smem:[#allocation9_spill]] %s2648_s20  ;;  %s1965_s23 = sadd.s32 4294967294, %s2652_s21  }
   0xb   : > { %3187 = sst [smem:[#allocation10_spill]] %s2652_s21  ;;  %s2764_s24 = sadd.s32 1, %s2652_s21  }
   0xc   : > { %3188 = sst [smem:[#allocation11_spill]] %s2764_s24  ;;  %s348_s25 = sadd.s32 1, %s2648_s20 }
   0xd   : > { %s345_s26 = ssub.s32 %s2652_s21, %s2764_s24  ;;  %p358_p0 = scmp.ne.s32.totalorder %s2648_s20, %s2644_s19 }
   0xe   : > { %p346_p1 = scmp.eq.s32.totalorder %s345_s26, 0  ;;  %p359_p2 = scmp.eq.s32.totalorder %s2760_s22, 1 }
   0xf   : > { %p364_p3 = scmp.ne.s32.totalorder %s2644_s19, %s2640_s18  ;;  %p365_p4 = scmp.eq.s32.totalorder %s1965_s23, 1 }
  0x10   : > { %s2775_s27 = scalar_select %p346_p1, %s2648_s20, %s348_s25  }
  0x11   : > { %p2777_p5 = por %p359_p2, %p358_p0  ;;  %p2781_p6 = por %p365_p4, %p364_p3 }
  0x12   : > { %3189 = sst [smem:[#allocation12_spill]] %s2775_s27  ;;  %p1968_p7 = scmp.ge.s32.totalorder %s2652_s21, 1 }
  0x13   : > { %s3191_s29 = scalar_select %p2781_p6, 1, 0 }
  0x14   : > { %p458_p8 = scmp.lt.s32.totalorder %s2652_s21, 3 }
  0x15   : > { %3192 = sst [smem:[#allocation13_spill]] %s3191_s29 }
  0x16   : > { %p459_p9 = pnand %p1968_p7, %p458_p8 }
  0x17   : > { %p521_p10 = scmp.lt.s32.totalorder (!%p459_p9), %s2760_s22, 1  ;;  %s3193_s1 = sld [smem:[#allocation15_spill]] (!%p459_p9)  ;;  %vm570_vm0 = vcmask (!%p459_p9), 392192   ;;  %v2654_v1 = vmov (!%p459_p9), 0   ;;  %v546_v2 = vld [vmem:[%s3162_s2] sm:$0xff] (!%p459_p9)  ;;  %v548_v3 = vld [vmem:[%s3162_s2 + $0x10] sm:$0xff] (!%p459_p9) }
  0x18   : > { %462 = sbr.rel (%p459_p9) target bundleno = 1267 (0x4f3), region = 72  ;;  %2524 = vset.pattern.permute.xlu0 (!%p459_p9), %v2654_v1  ;;  %2525 = vset.pattern.permute.xlu1 (!%p459_p9), %v2654_v1  ;;  %v547_v4 = vld [vmem:[%s3162_s2 + $0x8] sm:$0xff] (!%p459_p9)  ;;  %v549_v5 = vld [vmem:[%s3162_s2 + $0x18] sm:$0xff] (!%p459_p9)  ;;  %s3194_s0 = sld [smem:[#allocation14_spill]] (!%p459_p9)  ;;  %v1753_v6 = vld [vmem:[%s3170_s10] sm:$0xff] (!%p459_p9)  ;;  %vm719_vm1 = vcmask (!%p459_p9), 1040384  }
  0x19   : > { %552 = vperm.xlu0 (!%p459_p9), %2524, %v546_v2   ;;  %562 = vperm.xlu1 (!%p459_p9), %2525, %v548_v3   ;;  %v1754_v12 = vld [vmem:[%s3170_s10 + $0x8] sm:$0xf] (!%p459_p9)  ;;  %v692_v20 = vld [vmem:[%s3163_s3] sm:$0xff] (!%p459_p9)  ;;  %v694_v23 = vld [vmem:[%s3163_s3 + $0x10] sm:$0xff] (!%p459_p9)  ;;  %vm706_vm2 = vcmask (!%p459_p9), 400384   ;;  %s2896_s30 = sand.u32 (!%p459_p9), 1, %s2644_s19  }
  0x1a   : > { %v693_v21 = vld [vmem:[%s3163_s3 + $0x8] sm:$0xff] (!%p459_p9)  ;;  %v695_v24 = vld [vmem:[%s3163_s3 + $0x18] sm:$0xff] (!%p459_p9)  ;;  %v696_v26 = vld [vmem:[%s3163_s3 + $0x20] sm:$0xff] (!%p459_p9)  ;;  %s1969_s16 = sshll.u32 (!%p459_p9), %s2896_s30, 5  ;;  %vm945_vm3 = vcmask (!%p459_p9), 261120   ;;  %s2060_s24 = sshll.u32 (!%p459_p9), %s2760_s22, 9 }
  0x1b   : > { %v2358_v22 = vpack.c.bf16 (!%p459_p9), %v693_v21, %v692_v20  ;;  %v2362_v25 = vpack.c.bf16 (!%p459_p9), %v695_v24, %v694_v23  ;;  %v697_v27 = vld [vmem:[%s3163_s3 + $0x28] sm:$0xff] (!%p459_p9)  ;;  %v698_v29 = vld [vmem:[%s3163_s3 + $0x30] sm:$0x1] (!%p459_p9)  ;;  %v808_v30 = vld [vmem:[%s3165_s5] sm:$0xff] (!%p459_p9)  ;;  %s2902_s27 = scalar_lea.vmem (!%p459_p9), [#allocation2], %s1969_s16  ;;  %s3083_s26 = scalar_lea.hbm (!%p459_p9), %s3175_s15, %s2060_s24 }
  0x1c   : > { %v2366_v28 = vpack.c.bf16 (!%p459_p9), %v697_v27, %v696_v26  ;;  %v809_v31 = vld [vmem:[%s3165_s5 + $0x8] sm:$0xff] (!%p459_p9)  ;;  %v810_v57 = vld [vmem:[%s3165_s5 + $0x10] sm:$0xff] (!%p459_p9)  ;;  %v811_v58 = vld [vmem:[%s3165_s5 + $0x18] sm:$0xff] (!%p459_p9)  ;;  %s2655_s13 = smov (!%p459_p9), [#allocation2]  }
  0x1d   : > { %v536_v0 = vld [vmem:[%s3193_s1] sm:$0xff] (!%p459_p9)  ;;  %557 = vperm.xlu0 (!%p459_p9), %2524, %v547_v4   ;;  %567 = vperm.xlu1 (!%p459_p9), %2525, %v549_v5   ;;  %v537_v17 = vld [vmem:[%s3193_s1 + $0x8] sm:$0xff] (!%p459_p9)  ;;  %v538_v18 = vld [vmem:[%s3193_s1 + $0x10] sm:$0xff] (!%p459_p9)  ;;  %v2370_v32 = vpack.c.bf16 (!%p459_p9), %v809_v31, %v808_v30  ;;  %v2374_v60 = vpack.c.bf16 (!%p459_p9), %v811_v58, %v810_v57 }
  0x1e   : > { %2174 = vmatprep.mubr.msk.f32.mxu0 (!%p459_p9), %vm570_vm0, %v536_v0  ;;  %v539_v19 = vld [vmem:[%s3193_s1 + $0x18] sm:$0xff] (!%p459_p9)  ;;  %v812_v62 = vld [vmem:[%s3165_s5 + $0x20] sm:$0xff] (!%p459_p9)  ;;  %v813_v63 = vld [vmem:[%s3165_s5 + $0x28] sm:$0xff] (!%p459_p9)  ;;  %s2562_s1 = sshll.u32 (!%p459_p9), %s2655_s13, 4  ;;  %s2563_s1 = int_to_ptr.vmem [resolvable:$false] %s2562_s1 }
  0x1f   : > { %s2796_s25 = scalar_select %p521_p10, %s2760_s22, 1  ;;  %v2378_v2 = vpack.c.bf16 %v813_v63, %v812_v62  ;;  %v814_v3 = vld [vmem:[%s3165_s5 + $0x30] sm:$0x1]  ;;  %v934_v4 = vld [vmem:[%s3167_s7] sm:$0xff]  ;;  %v935_v5 = vld [vmem:[%s3167_s7 + $0x8] sm:$0xff] }
  0x20   : > { %s2564_s22 = scalar_lea.vmem %s2563_s1, 1024 }
  0x21   : > { %s2476_s20 = smul.u32 48, %s2796_s25  ;;  %1757 = vperm.xlu0 %2524, %v1753_v6   ;;  %1762 = vperm.xlu1 %2525, %v1754_v12   ;;  %v936_v6 = vld [vmem:[%s3167_s7 + $0x10] sm:$0xff]  ;;  %s2058_s21 = sshll.u32 %s2796_s25, 5 }
  0x22   : > { %s530_s29 = scalar_lea.vmem %s3172_s12, %s2058_s21 }
  0x23   : > { %s525_s18 = scalar_lea.vmem %s3194_s0, %s2476_s20  ;;  %s2915_s20 = scalar_lea.vmem [#allocation4], %s1969_s16 }
  0x24   : > { %v540_v7 = vld [vmem:[%s525_s18] sm:$0xff]  ;;  %v541_v8 = vld [vmem:[%s525_s18 + $0x8] sm:$0xff]  ;;  %v542_v9 = vld [vmem:[%s525_s18 + $0x10] sm:$0xff]  ;;  %s1818_s0 = sshll.u32 %s2902_s27, 4  ;;  %s1834_s21 = sshll.u32 %s2915_s20, 4  ;;  %s3070_s0 = int_to_ptr.vmem [resolvable:$true] %s1818_s0  ;;  %s3072_s21 = int_to_ptr.vmem [resolvable:$true] %s1834_s21 }
  0x25   : > { %v2346_v10 = vpack.c.bf16 %v541_v8, %v540_v7  ;;  %v543_v11 = vld [vmem:[%s525_s18 + $0x18] sm:$0xff]  ;;  %v544_v14 = vld [vmem:[%s525_s18 + $0x20] sm:$0xff]  ;;  %v545_v15 = vld [vmem:[%s525_s18 + $0x28] sm:$0xff]  ;;  %v2382_v7 = vpack.c.bf16 %v935_v5, %v934_v4  ;;  %s3078_s16 = scalar_lea.hbm %s3174_s14, %s2060_s24  ;;  %p2565_p0 = scmp.lt.s32.totalorder %s3070_s0, %s2563_s1 }
  0x26   : > { %v2350_v13 = vpack.c.bf16 %v543_v11, %v542_v9  ;;  %v2354_v16 = vpack.c.bf16 %v545_v15, %v544_v14  ;;  %v937_v8 = vld [vmem:[%s3167_s7 + $0x18] sm:$0xff]  ;;  %v2008_v4 = vld [vmem:[%s3171_s11 + $0x40] sm:$0xff] }
  0x27   : > { %2347 = vmatprep.subr.bf16.mxu0 %v2346_v10  ;;  %v2386_v9 = vpack.c.bf16 %v937_v8, %v936_v6  ;;  %2383 = vmatprep.subr.bf16.mxu1 %v2382_v7  ;;  %v2009_v8 = vld [vmem:[%s3171_s11 + $0x48] sm:$0xff] }
  0x28   : > { %2349 = vmatpush3.bf16.msra.mxu0 %v2346_v10  ;;  %2385 = vmatpush3.bf16.msra.mxu1 %v2382_v7  ;;  %v1984_v10 = vld [vmem:[%s3164_s4] ss:$0 sm:$0xff] }
  0x29   : > { %2351 = vmatprep.subr.bf16.mxu0 %v2350_v13  ;;  %2387 = vmatprep.subr.bf16.mxu1 %v2386_v9 }
  0x2c   : > { %2353 = vmatpush3.bf16.msra.mxu0 %v2350_v13  ;;  %2389 = vmatpush3.bf16.msra.mxu1 %v2386_v9  ;;  %v2010_v9 = vld [vmem:[%s3171_s11 + $0x50] sm:$0xff] }
  0x2d   : > { %2355 = vmatprep.subr.bf16.mxu0 %v2354_v16 }
  0x30   : > { %2357 = vmatpush3.bf16.msra.mxu0 %v2354_v16 }
  0x31   : > { %2359 = vmatprep.subr.bf16.mxu0 %v2358_v22 }
  0x33   : > { %2175 = vmatmul.mubr.msk.f32.vlgmr.msra.gmra.mrb[0].mxu0 %vm570_vm0, %v537_v17 }
  0x34   : > { %2177 = vmatprep.mubr.msk.f32.mxu0 %vm570_vm0, %v538_v18  ;;  %2361 = vmatpush3.bf16.msra.mxu0 %v2358_v22 }
  0x35   : > { %2363 = vmatprep.subr.bf16.mxu0 %v2362_v25 }
  0x37   : > { %2178 = vmatmul.mubr.msk.f32.gmra.mrb[2].mxu0 %vm570_vm0, %v539_v19  ;;  %v1990_v19 = vld [vmem:[%s3166_s6] ss:$0 sm:$0xff] }
  0x38   : > { %2365 = vmatpush3.bf16.msra.mxu0 %v2362_v25 }
  0x39   : > { %2367 = vmatprep.subr.bf16.mxu0 %v2366_v28 }
  0x3c   : > { %2369 = vmatpush3.bf16.msra.mxu0 %v2366_v28 }
  0x3d   : > { %2192 = vmatprep.subr.msk.mxu0 %vm719_vm1, %v698_v29 }
  0x40   : > { %2193 = vmatpush3.msk.msra.mxu0 %vm719_vm1, %v698_v29 }
  0x41   : > { %2371 = vmatprep.subr.bf16.mxu0 %v2370_v32 }
  0x98   : > { %v553_v33 = vpop.permute.xlu0 %552  ;;  %v563_v34 = vpop.permute.xlu1 %562 }
  0x9c   : > { %v558_v35 = vpop.permute.xlu0 %557  ;;  %v568_v42 = vpop.permute.xlu1 %567 }
 0x106   : > { %v2176_v36 = vpop.f32.mrb[0].mxu0 }
 0x107   : > { %v655_v37 = vadd.f32 %v2176_v36, %v558_v35  ;;  %v649_v38 = vpop.f32.mrb[1].mxu0  ;;  %v911_v36 = vld [vmem:[%s530_s29 + $0x8] sm:$0xff] }
 0x108   : > { %v650_v39 = vadd.f32 %v649_v38, %v553_v33 }
 0x109   : > { %v1981_v40 = vmul.f32 -1.442695, %v655_v37  ;;  %v910_v37 = vld [vmem:[%s530_s29] sm:$0xff] }
 0x10a   : > { %v1980_v41 = vmul.f32 -1.442695, %v650_v39  ;;  %v2179_v43 = vpop.f32.mrb[2].mxu0 }
 0x10b   : > { %2526 = vpow2.f32 %v1981_v40  ;;  %v665_v44 = vadd.f32 %v2179_v43, %v568_v42  ;;  %v659_v45 = vpop.f32.mrb[3].mxu0  ;;  %v913_v42 = vld [vmem:[%s530_s29 + $0x18] sm:$0xff] }
 0x10c   : > { %2528 = vpow2.f32 %v1980_v41  ;;  %v660_v46 = vadd.f32 %v659_v45, %v563_v34 }
 0x10d   : > { %v1983_v47 = vmul.f32 -1.442695, %v665_v44  ;;  %v912_v44 = vld [vmem:[%s530_s29 + $0x10] sm:$0xff] }
 0x10e   : > { %v1982_v48 = vmul.f32 -1.442695, %v660_v46 }
 0x10f   : > { %2530 = vpow2.f32 %v1983_v47 }
 0x110   : > { %2532 = vpow2.f32 %v1982_v48 }
 0x115   : > { %v2527_v49 = vpop.eup %2526 }
 0x116   : > { %v2529_v50 = vpop.eup %2528  ;;  %v681_v51 = vadd.f32 1.0, %v2527_v49 }
 0x117   : > { %v680_v52 = vadd.f32 1.0, %v2529_v50 }
 0x119   : > { %v2531_v53 = vpop.eup %2530  ;;  %2534 = vrcp.f32 %v680_v52  ;;  %v2003_v52 = vld [vmem:[%s3169_s9 + $0x10] sm:$0xff] }
 0x11a   : > { %v2533_v54 = vpop.eup %2532  ;;  %2536 = vrcp.f32 %v681_v51  ;;  %v683_v55 = vadd.f32 1.0, %v2531_v53  ;;  %v1047_v53 = vld [vmem:[%s3169_s9] sm:$0xff] }
 0x11b   : > { %v682_v56 = vadd.f32 1.0, %v2533_v54  ;;  %v1996_v54 = vld [vmem:[%s3168_s8] ss:$0 sm:$0xff] }
 0x11c   : > { %2538 = vrcp.f32 %v683_v55 }
 0x11d   : > { %2540 = vrcp.f32 %v682_v56 }
 0x123   : > { %v2535_v59 = vpop.eup %2534 }
 0x124   : > { %v2537_v61 = vpop.eup %2536  ;;  %2194 = vmatprep.mubr.msk.f32.mxu0 %vm706_vm2, %v2535_v59 }
 0x125   : > { %2195 = vmatmul.mubr.msk.f32.vlgmr.msra.gmra.mrb[4].mxu0 %vm706_vm2, %v2537_v61 }
 0x126   : > { %v2539_v0 = vpop.eup %2538  ;;  %2373 = vmatpush3.bf16.msra.mxu0 %v2370_v32 }
 0x127   : > { %v2541_v1 = vpop.eup %2540  ;;  %2375 = vmatprep.subr.bf16.mxu0 %v2374_v60 }
 0x128   : > { %2197 = vmatprep.mubr.msk.f32.mxu0 %vm706_vm2, %v2541_v1 }
 0x129   : > { %2198 = vmatmul.mubr.msk.f32.gmra.mrb[6].mxu0 %vm706_vm2, %v2539_v0 }
 0x12a   : > { %2377 = vmatpush3.bf16.msra.mxu0 %v2374_v60  ;;  %2214 = vmatprep.mubr.msk.f32.mxu0 %vm706_vm2, %v2535_v59 }
 0x12b   : > { %2379 = vmatprep.subr.bf16.mxu0 %v2378_v2 }
 0x12e   : > { %2381 = vmatpush3.bf16.msra.mxu0 %v2378_v2 }
 0x12f   : > { %2212 = vmatprep.subr.msk.mxu0 %vm719_vm1, %v814_v3 }
 0x132   : > { %2213 = vmatpush3.msk.msra.mxu0 %vm719_vm1, %v814_v3  ;;  %v2007_v3 = vld [vmem:[%s3171_s11 + $0x38] sm:$0xff] }
 0x133   : > { %2215 = vmatmul.mubr.msk.f32.vlgmr.msra.gmra.mrb[8].mxu0 %vm706_vm2, %v2537_v61  ;;  %v2406_v7 = vpack.c.bf16 %v2008_v4, %v2007_v3 }
 0x134   : > { %2217 = vmatprep.mubr.msk.f32.mxu0 %vm706_vm2, %v2541_v1 }
 0x137   : > { %2218 = vmatmul.mubr.msk.f32.gmra.mrb[10].mxu0 %vm706_vm2, %v2539_v0 }
 0x138   : > { %2253 = vmatprep.mubr.msk.f32.mxu0 %vm945_vm3, %v2003_v52  ;;  %v2041_v52 = vld [vmem:[%s3171_s11 + $0xc0] sm:$0xff] }
 0x1f8   : > { %v2196_v11 = vpop.f32.mrb[4].mxu0 }
 0x1f9   : > { %v795_v12 = vadd.f32 %v2196_v11, %v1984_v10  ;;  %v789_v13 = vpop.f32.mrb[5].mxu0  ;;  %v1048_v11 = vld [vmem:[%s3169_s9 + $0x8] sm:$0xf] }
 0x1fa   : > { %v790_v14 = vadd.f32 %v1984_v10, %v789_v13  ;;  %v2410_v13 = vpack.c.bf16 %v2010_v9, %v2009_v8 }
 0x1fb   : > { %1784 = vst.msk [vmem:[%s2902_s27 + $0x8] sm:$0xff] %vm945_vm3, %v795_v12 }
 0x1fc   : > { %1783 = vst.msk [vmem:[%s2902_s27] sm:$0xff] %vm945_vm3, %v790_v14  ;;  %v2199_v15 = vpop.f32.mrb[6].mxu0 }
 0x1fd   : > { %v805_v16 = vadd.f32 %v2199_v15, %v1984_v10  ;;  %v799_v17 = vpop.f32.mrb[7].mxu0  ;;  %v2012_v15 = vld [vmem:[%s3171_s11 + $0x60] sm:$0xff] }
 0x1fe   : > { %v800_v18 = vadd.f32 %v1984_v10, %v799_v17  ;;  %v2004_v10 = vld [vmem:[%s3169_s9 + $0x18] sm:$0xf]  ;;  %v2021_v17 = vld [vmem:[%s3169_s9 + $0x28] sm:$0xf] }
 0x1ff   : > { %1786 = vst.msk [vmem:[%s2902_s27 + $0x18] sm:$0xff] %vm945_vm3, %v805_v16 }
 0x200   : > { %1785 = vst.msk [vmem:[%s2902_s27 + $0x10] sm:$0xff] %vm945_vm3, %v800_v18  ;;  %s1797_s27 = scalar_lea.sflag [#allocation3], %s2896_s30 }
 0x206   : > { %v2216_v20 = vpop.f32.mrb[8].mxu0 }
 0x207   : > { %v897_v21 = vadd.f32 %v2216_v20, %v1990_v19  ;;  %v891_v22 = vpop.f32.mrb[9].mxu0  ;;  %v2013_v20 = vld [vmem:[%s3171_s11 + $0x68] sm:$0x1] }
 0x208   : > { %v892_v23 = vadd.f32 %v1990_v19, %v891_v22  ;;  %v1131_v22 = vld [vmem:[%s3171_s11 + $0x8] sm:$0xff] }
 0x209   : > { %v915_v24 = vmul.f32 0.5, %v897_v21  ;;  %1788 = vst.msk [vmem:[%s2915_s20 + $0x8] sm:$0xff] %vm945_vm3, %v897_v21  ;;  %v1130_v21 = vld [vmem:[%s3171_s11] sm:$0xff] }
 0x20a   : > { %v914_v25 = vmul.f32 0.5, %v892_v23  ;;  %1787 = vst.msk [vmem:[%s2915_s20] sm:$0xff] %vm945_vm3, %v892_v23  ;;  %v2219_v26 = vpop.f32.mrb[10].mxu0  ;;  %v2418_v23 = vpack.c.bf16 %v1131_v22, %v1130_v21 }
 0x20b   : > { %v920_v27 = vmul.f32 1.442695, %v915_v24  ;;  %v907_v28 = vadd.f32 %v2219_v26, %v1990_v19  ;;  %v901_v29 = vpop.f32.mrb[11].mxu0  ;;  %v1132_v24 = vld [vmem:[%s3171_s11 + $0x10] sm:$0xff] }
 0x20c   : > { %v918_v30 = vmul.f32 1.442695, %v914_v25  ;;  %v902_v31 = vadd.f32 %v1990_v19, %v901_v29  ;;  %v2035_v19 = vld [vmem:[%s3169_s9 + $0x38] sm:$0xf] }
 0x20d   : > { %2542 = vpow2.f32 %v920_v27  ;;  %v917_v32 = vmul.f32 0.5, %v907_v28  ;;  %1790 = vst.msk [vmem:[%s2915_s20 + $0x18] sm:$0xff] %vm945_vm3, %v907_v28  ;;  %v1133_v25 = vld [vmem:[%s3171_s11 + $0x18] sm:$0xff] }
 0x20e   : > { %2544 = vpow2.f32 %v918_v30  ;;  %v916_v33 = vmul.f32 0.5, %v902_v31  ;;  %1789 = vst.msk [vmem:[%s2915_s20 + $0x10] sm:$0xff] %vm945_vm3, %v902_v31  ;;  %v2422_v29 = vpack.c.bf16 %v1133_v25, %v1132_v24  ;;  %v1134_v31 = vld [vmem:[%s3171_s11 + $0x20] sm:$0xff]  ;;  %s2558_s20 = scalar_lea.vmem %s3070_s0, 512 }
 0x20f   : > { %v924_v34 = vmul.f32 1.442695, %v917_v32  ;;  %v1135_v32 = vld [vmem:[%s3171_s11 + $0x28] sm:$0xff]  ;;  %p2559_p11 = scmp.ne.s32.totalorder %s3070_s0, %s2558_s20  ;;  %p2566_p1 = scmp.lt.s32.totalorder %s2564_s22, %s2558_s20 }
 0x210   : > { %v922_v35 = vmul.f32 1.442695, %v916_v33  ;;  %v2426_v33 = vpack.c.bf16 %v1135_v32, %v1134_v31 }
 0x211   : > { %2546 = vpow2.f32 %v924_v34  ;;  %p2560_p12 = pnand %p2559_p11, %p2777_p5  ;;  %p2567_p2 = por %p2566_p1, %p2565_p0 }
 0x212   : > { %2548 = vpow2.f32 %v922_v35 }
 0x213   : > { %p2561_p13 = pneg %p2560_p12 }
 0x215   : > { %p2568_p3 = pnand %p2567_p2, %p2561_p13 }
 0x217   : > { %v2543_v38 = vpop.eup %2542 }
 0x218   : > { %v2545_v39 = vpop.eup %2544  ;;  %v927_v40 = vmul.f32 %v2543_v38, %v911_v36  ;;  %v1136_v36 = vld [vmem:[%s3171_s11 + $0x30] sm:$0x1]  ;;  %v2025_v38 = vld [vmem:[%s3171_s11 + $0x78] sm:$0xff] }
 0x219   : > { %v926_v41 = vmul.f32 %v2545_v39, %v910_v37  ;;  %v2024_v37 = vld [vmem:[%s3171_s11 + $0x70] sm:$0xff]  ;;  %v2026_v39 = vld [vmem:[%s3171_s11 + $0x80] sm:$0xff] }
 0x21a   : > { %v931_v43 = vadd.f32 %v927_v40, %v795_v12  ;;  %v2020_v12 = vld [vmem:[%s3169_s9 + $0x20] sm:$0xff]  ;;  %v2027_v40 = vld [vmem:[%s3171_s11 + $0x88] sm:$0xff] }
 0x21b   : > { %v2547_v45 = vpop.eup %2546  ;;  %v930_v46 = vadd.f32 %v926_v41, %v790_v14  ;;  %v2011_v14 = vld [vmem:[%s3171_s11 + $0x58] sm:$0xff]  ;;  %v2438_v41 = vpack.c.bf16 %v2025_v38, %v2024_v37 }
 0x21c   : > { %v2549_v47 = vpop.eup %2548  ;;  %v929_v48 = vmul.f32 %v2547_v45, %v913_v42  ;;  %v2442_v42 = vpack.c.bf16 %v2027_v40, %v2026_v39 }
 0x21d   : > { %2228 = vmatprep.mubr.msk.f32.mxu1 %vm945_vm3, %v930_v46  ;;  %v928_v49 = vmul.f32 %v2549_v47, %v912_v44  ;;  %v2029_v44 = vld [vmem:[%s3171_s11 + $0x98] sm:$0xff] }
 0x21e   : > { %2229 = vmatmul.mubr.msk.f32.vlgmr.msra.gmra.mrb[0].mxu1 %vm945_vm3, %v931_v43  ;;  %v933_v50 = vadd.f32 %v929_v48, %v805_v16  ;;  %v2414_v16 = vpack.c.bf16 %v2012_v15, %v2011_v14  ;;  %v2028_v43 = vld [vmem:[%s3171_s11 + $0x90] sm:$0xff]  ;;  %v2030_v48 = vld [vmem:[%s3171_s11 + $0xa0] sm:$0x1] }
 0x21f   : > { %v932_v51 = vadd.f32 %v928_v49, %v800_v18  ;;  %v2034_v18 = vld [vmem:[%s3169_s9 + $0x30] sm:$0xff]  ;;  %v2446_v47 = vpack.c.bf16 %v2029_v44, %v2028_v43  ;;  %v2038_v49 = vld [vmem:[%s3171_s11 + $0xa8] sm:$0xff] }
 0x221   : > { %2231 = vmatprep.mubr.msk.f32.mxu1 %vm945_vm3, %v932_v51  ;;  %v2040_v51 = vld [vmem:[%s3171_s11 + $0xb8] sm:$0xff] }
 0x222   : > { %2232 = vmatmul.mubr.msk.f32.gmra.mrb[2].mxu1 %vm945_vm3, %v933_v50  ;;  %v2039_v50 = vld [vmem:[%s3171_s11 + $0xb0] sm:$0xff] }
 0x223   : > { %2242 = vmatprep.mubr.msk.f32.mxu1 %vm945_vm3, %v1047_v53  ;;  %v2458_v53 = vpack.c.bf16 %v2039_v50, %v2038_v49 }
 0x2f1   : > { %v2230_v55 = vpop.f32.mrb[0].mxu1 }
 0x2f2   : > { %v1030_v56 = vadd.f32 %v2230_v55, %v1996_v54  ;;  %v1024_v57 = vpop.f32.mrb[1].mxu1  ;;  %v2042_v55 = vld [vmem:[%s3171_s11 + $0xc8] sm:$0xff] }
 0x2f3   : > { %v1025_v58 = vadd.f32 %v1996_v54, %v1024_v57 }
 0x2f4   : > { %v1044_v59 = vmax.f32 %v1030_v56, 0.0  ;;  %v2043_v56 = vld [vmem:[%s3171_s11 + $0xd0] sm:$0xff] }
 0x2f5   : > { %v1043_v60 = vmax.f32 %v1025_v58, 0.0  ;;  %v2233_v61 = vpop.f32.mrb[2].mxu1  ;;  %v2466_v57 = vpack.c.bf16 %v2043_v56, %v2042_v55  ;;  %v2044_v58 = vld [vmem:[%s3171_s11 + $0xd8] sm:$0x1] }
 0x2f6   : > { %v1040_v62 = vadd.f32 %v2233_v61, %v1996_v54  ;;  %v1034_v63 = vpop.f32.mrb[3].mxu1 }
 0x2f7   : > { %v2390_v0 = vpack.c.bf16 %v1044_v59, %v1043_v60  ;;  %v1035_v1 = vadd.f32 %v1996_v54, %v1034_v63  ;;  %v2462_v54 = vpack.c.bf16 %v2041_v52, %v2040_v51 }
 0x2f8   : > { %v1046_v2 = vmax.f32 %v1040_v62, 0.0 }
 0x2f9   : > { %v1045_v5 = vmax.f32 %v1035_v1, 0.0  ;;  %2391 = vmatprep.subr.bf16.mxu1 %v2390_v0  ;;  %2399 = vmatprep.subr.bf16.mxu0 %v2390_v0 }
 0x2fa   : > { %2393 = vmatpush3.bf16.msra.mxu1 %v2390_v0  ;;  %2401 = vmatpush3.bf16.msra.mxu0 %v2390_v0 }
 0x2fb   : > { %v2394_v6 = vpack.c.bf16 %v1046_v2, %v1045_v5 }
 0x2fd   : > { %2395 = vmatprep.subr.bf16.mxu1 %v2394_v6  ;;  %2403 = vmatprep.subr.bf16.mxu0 %v2394_v6 }
 0x2fe   : > { %2397 = vmatpush3.bf16.msra.mxu1 %v2394_v6  ;;  %2405 = vmatpush3.bf16.msra.mxu0 %v2394_v6 }
 0x2ff   : > { %2431 = vmatprep.subr.bf16.mxu0 %v2390_v0  ;;  %2407 = vmatprep.subr.bf16.mxu1 %v2406_v7 }
 0x301   : > { %2254 = vmatmul.mubr.msk.f32.vlgmr.msra.gmra.mrb[12].mxu0 %vm945_vm3, %v2004_v10  ;;  %2243 = vmatmul.mubr.msk.f32.vlgmr.msra.gmra.mrb[4].mxu1 %vm945_vm3, %v1048_v11 }
 0x302   : > { %2433 = vmatpush3.bf16.msra.mxu0 %v2390_v0  ;;  %2298 = vmatprep.mubr.msk.f32.mxu0 %vm945_vm3, %v2020_v12 }
 0x303   : > { %2435 = vmatprep.subr.bf16.mxu0 %v2394_v6  ;;  %2409 = vmatpush3.bf16.msra.mxu1 %v2406_v7 }
 0x304   : > { %2411 = vmatprep.subr.bf16.mxu1 %v2410_v13 }
 0x306   : > { %2437 = vmatpush3.bf16.msra.mxu0 %v2394_v6 }
 0x307   : > { %2451 = vmatprep.subr.bf16.mxu0 %v2390_v0  ;;  %2413 = vmatpush3.bf16.msra.mxu1 %v2410_v13 }
 0x308   : > { %2415 = vmatprep.subr.bf16.mxu1 %v2414_v16 }
 0x309   : > { %2299 = vmatmul.mubr.msk.f32.vlgmr.msra.gmra.mrb[14].mxu0 %vm945_vm3, %v2021_v17 }
 0x30a   : > { %2453 = vmatpush3.bf16.msra.mxu0 %v2390_v0  ;;  %2326 = vmatprep.mubr.msk.f32.mxu0 %vm945_vm3, %v2034_v18 }
 0x30b   : > { %2455 = vmatprep.subr.bf16.mxu0 %v2394_v6  ;;  %2417 = vmatpush3.bf16.msra.mxu1 %v2414_v16 }
 0x30c   : > { %2268 = vmatprep.subr.msk.mxu1 %vm719_vm1, %v2013_v20 }
 0x30e   : > { %2457 = vmatpush3.bf16.msra.mxu0 %v2394_v6 }
 0x30f   : > { %2269 = vmatpush3.msk.msra.mxu1 %vm719_vm1, %v2013_v20 }
 0x310   : > { %2419 = vmatprep.subr.bf16.mxu1 %v2418_v23 }
 0x311   : > { %2327 = vmatmul.mubr.msk.f32.vlgmr.msra.gmra.mrb[16].mxu0 %vm945_vm3, %v2035_v19 }
 0x3d4   : > { %v2255_v26 = vpop.f32.mrb[12].mxu0  ;;  %v2244_v27 = vpop.f32.mrb[4].mxu1 }
 0x3d5   : > { %v1212_v28 = vpop.f32.mrb[13].mxu0  ;;  %v1121_v30 = vpop.f32.mrb[5].mxu1 }
 0x3d6   : > { %2270 = vmatprep.mubr.msk.f32.mxu1 %vm706_vm2, %v1212_v28 }
 0x3d7   : > { %2271 = vmatmul.mubr.msk.f32.vlgmr.msra.gmra.mrb[6].mxu1 %vm706_vm2, %v2255_v26 }
 0x3d8   : > { %2421 = vmatpush3.bf16.msra.mxu1 %v2418_v23  ;;  %2287 = vmatprep.mubr.msk.f32.mxu1 %vm706_vm2, %v1121_v30 }
 0x3d9   : > { %2423 = vmatprep.subr.bf16.mxu1 %v2422_v29 }
 0x3dc   : > { %2425 = vmatpush3.bf16.msra.mxu1 %v2422_v29  ;;  %v2300_v34 = vpop.f32.mrb[14].mxu0 }
 0x3dd   : > { %2427 = vmatprep.subr.bf16.mxu1 %v2426_v33  ;;  %v1472_v35 = vpop.f32.mrb[15].mxu0 }
 0x3e0   : > { %2429 = vmatpush3.bf16.msra.mxu1 %v2426_v33 }
 0x3e1   : > { %2285 = vmatprep.subr.msk.mxu1 %vm719_vm1, %v1136_v36 }
 0x3e4   : > { %2286 = vmatpush3.msk.msra.mxu1 %vm719_vm1, %v1136_v36  ;;  %v2328_v45 = vpop.f32.mrb[16].mxu0 }
 0x3e5   : > { %2288 = vmatmul.mubr.msk.f32.vlgmr.msra.gmra.mrb[6].mxu1 %vm706_vm2, %v2244_v27  ;;  %2439 = vmatprep.subr.bf16.mxu1 %v2438_v41  ;;  %v1650_v46 = vpop.f32.mrb[17].mxu0 }
 0x3e6   : > { %2441 = vmatpush3.bf16.msra.mxu1 %v2438_v41  ;;  %2315 = vmatprep.mubr.msk.f32.mxu1 %vm706_vm2, %v1472_v35 }
 0x3e7   : > { %2443 = vmatprep.subr.bf16.mxu1 %v2442_v42 }
 0x3ea   : > { %2445 = vmatpush3.bf16.msra.mxu1 %v2442_v42 }
 0x3eb   : > { %2447 = vmatprep.subr.bf16.mxu1 %v2446_v47 }
 0x3ee   : > { %2449 = vmatpush3.bf16.msra.mxu1 %v2446_v47 }
 0x3ef   : > { %2313 = vmatprep.subr.msk.mxu1 %vm719_vm1, %v2030_v48 }
 0x3f2   : > { %2314 = vmatpush3.msk.msra.mxu1 %vm719_vm1, %v2030_v48 }
 0x3f3   : > { %2316 = vmatmul.mubr.msk.f32.vlgmr.msra.gmra.mrb[6].mxu1 %vm706_vm2, %v2300_v34  ;;  %2459 = vmatprep.subr.bf16.mxu1 %v2458_v53 }
 0x3f4   : > { %2461 = vmatpush3.bf16.msra.mxu1 %v2458_v53  ;;  %2343 = vmatprep.mubr.msk.f32.mxu1 %vm706_vm2, %v1650_v46 }
 0x3f5   : > { %2463 = vmatprep.subr.bf16.mxu1 %v2462_v54 }
 0x3f8   : > { %2465 = vmatpush3.bf16.msra.mxu1 %v2462_v54 }
 0x3f9   : > { %2467 = vmatprep.subr.bf16.mxu1 %v2466_v57 }
 0x3fc   : > { %2469 = vmatpush3.bf16.msra.mxu1 %v2466_v57 }
 0x3fd   : > { %2341 = vmatprep.subr.msk.mxu1 %vm719_vm1, %v2044_v58 }
 0x400   : > { %2342 = vmatpush3.msk.msra.mxu1 %vm719_vm1, %v2044_v58 }
 0x401   : > { %2344 = vmatmul.mubr.msk.f32.vlgmr.msra.gmra.mrb[6].mxu1 %vm706_vm2, %v2328_v45 }
 0x402   : > { %2571 = shalt.err (!%p2568_p3)
}
 0x403   : > { %s2572_s24 = scalar_lea.hbm %s3078_s16, 512  ;;  %s2576_s17 = scalar_lea.hbm %s3174_s14, 1024 }
 0x404   : > { %p2573_p4 = scmp.ne.s32.totalorder %s3078_s16, %s2572_s24  ;;  %p2577_p9 = scmp.lt.u32.totalorder %s3078_s16, %s3174_s14 }
 0x405   : > { %p2578_p10 = scmp.lt.u32.totalorder %s2576_s17, %s2572_s24  ;;  %p2580_p12 = scmp.lt.u32.totalorder %s2572_s24, %s3078_s16 }
 0x406   : > { %p2574_p7 = pnand %p2573_p4, %p2777_p5 }
 0x407   : > { %p2579_p11 = por %p2578_p10, %p2577_p9 }
 0x408   : > { %p2575_p8 = pneg %p2574_p7 }
 0x409   : > { %p2581_p13 = por %p2580_p12, %p2579_p11 }
 0x40b   : > { %p2582_p0 = pnand %p2581_p13, %p2575_p8 }
 0x40d   : > { %2585 = shalt.err (!%p2582_p0)
}
 0x40e   : > { %s2656_s20 = smov 128   ;;  %s2657_s13 = smov 8  }
 0x40f   : > { %2477 = dma.vmem_to_hbm [thread:$0]  (%p2777_p5), %s3070_s0, 512, %s3078_s16, %s1797_s27, %s2656_s20, %s2656_s20, %s2657_s13  }
 0x410   : > { %s1802_s22 = scalar_lea.sflag [#allocation5], %s2896_s30  ;;  %s2586_s24 = scalar_lea.vmem %s3072_s21, 512 }
 0x411   : > { %p2587_p1 = scmp.ne.s32.totalorder %s3072_s21, %s2586_s24  ;;  %s2658_s18 = smov [#allocation4]  }
 0x412   : > { %s2590_s29 = sshll.u32 %s2658_s18, 4  ;;  %s2591_s29 = int_to_ptr.vmem [resolvable:$false] %s2590_s29 }
 0x413   : > { %p2588_p2 = pnand %p2587_p1, %p2777_p5  ;;  %s2592_s17 = scalar_lea.vmem %s2591_s29, 1024 }
 0x414   : > { %p2593_p4 = scmp.lt.s32.totalorder %s3072_s21, %s2591_s29  ;;  %p2594_p7 = scmp.lt.s32.totalorder %s2592_s17, %s2586_s24 }
 0x415   : > { %p2589_p3 = pneg %p2588_p2 }
 0x416   : > { %p2595_p8 = por %p2594_p7, %p2593_p4 }
 0x418   : > { %p2596_p9 = pnand %p2595_p8, %p2589_p3 }
 0x41a   : > { %2599 = shalt.err (!%p2596_p9)
}
 0x41b   : > { %s2600_s0 = scalar_lea.hbm %s3083_s26, 512  ;;  %s2604_s23 = scalar_lea.hbm %s3175_s15, 1024 }
 0x41c   : > { %p2601_p10 = scmp.ne.s32.totalorder %s3083_s26, %s2600_s0  ;;  %p2605_p13 = scmp.lt.u32.totalorder %s3083_s26, %s3175_s15 }
 0x41d   : > { %p2606_p0 = scmp.lt.u32.totalorder %s2604_s23, %s2600_s0  ;;  %p2608_p2 = scmp.lt.u32.totalorder %s2600_s0, %s3083_s26 }
 0x41e   : > { %p2602_p11 = pnand %p2601_p10, %p2777_p5 }
 0x41f   : > { %p2607_p1 = por %p2606_p0, %p2605_p13 }
 0x420   : > { %p2603_p12 = pneg %p2602_p11 }
 0x421   : > { %p2609_p3 = por %p2608_p2, %p2607_p1 }
 0x423   : > { %p2610_p4 = pnand %p2609_p3, %p2603_p12 }
 0x425   : > { %2613 = shalt.err (!%p2610_p4)
}
 0x426   : > { %2478 = dma.vmem_to_hbm [thread:$0]  (%p2777_p5), %s3072_s21, 512, %s3083_s26, %s1802_s22, %s2656_s20, %s2656_s20, %s2657_s13   ;;  %v1763_v59 = vpop.permute.xlu1 %1762  ;;  %v1758_v61 = vpop.permute.xlu0 %1757  ;;  %vm1781_vm4 = vcmask 519168   ;;  %vm1779_vm5 = vcmask 523264  }
 0x427   : > { %s2059_s28 = sshll.u32 %s2796_s25, 4  ;;  %s3195_s26 = sld [smem:[#allocation16_spill]] }
 0x42d   : > { %s535_s20 = scalar_lea.vmem %s3195_s26, %s2059_s28 }
 0x4d4   : > { %v2345_v60 = vpop.f32.mrb[6].mxu1 }
 0x4d5   : > { %v1766_v62 = vadd.f32 %v2345_v60, %v1763_v59  ;;  %v1742_v63 = vpop.f32.mrb[7].mxu1 }
 0x4d6   : > { %v1765_v0 = vadd.f32 %v1758_v61, %v1742_v63 }
 0x4d7   : > { %v2049_v1 = vmul.f32 -1.442695, %v1766_v62 }
 0x4d8   : > { %v2048_v2 = vmul.f32 -1.442695, %v1765_v0 }
 0x4d9   : > { %2550 = vpow2.f32 %v2049_v1 }
 0x4da   : > { %2552 = vpow2.f32 %v2048_v2 }
 0x4e3   : > { %v2551_v3 = vpop.eup %2550 }
 0x4e4   : > { %v2553_v4 = vpop.eup %2552  ;;  %v1774_v5 = vadd.f32 1.0, %v2551_v3 }
 0x4e5   : > { %v1773_v6 = vadd.f32 1.0, %v2553_v4 }
 0x4e6   : > { %2554 = vrcp.f32 %v1774_v5 }
 0x4e7   : > { %2556 = vrcp.f32 %v1773_v6 }
 0x4f0   : > { %v2555_v7 = vpop.eup %2554 }
 0x4f1   : > { %v2557_v8 = vpop.eup %2556  ;;  %1782 = vst.msk [vmem:[%s535_s20 + $0x8] sm:$0xf] %vm1781_vm4, %v2555_v7 }
 0x4f2   : > { %1780 = vst.msk [vmem:[%s535_s20] sm:$0xff] %vm1779_vm5, %v2557_v8 }
 0x4f3 PF: > { %s3196_s13 = sld [smem:[#allocation10_spill]]  ;;  %s3197_s22 = sld [smem:[#allocation8_spill]] }
 0x4f9   : > { %p2488_p5 = scmp.ge.s32.totalorder %s3196_s13, 2  ;;  %s1857_s29 = sand.u32 1, %s3197_s22  }
 0x4fa   : > { %s1858_s17 = scalar_lea.sflag [#allocation3], %s1857_s29 }
 0x4fb   : > { %p2482_p7 = pnand %p2488_p5, %p2781_p6 }
 0x4fd   : > { %2631 = dma.done.wait (!%p2482_p7), %s1858_s17, 512  }
 0x4fe   : > { %2633 = vsyncadd (!%p2482_p7), %s1858_s17, 4294966784  ;;  %s1867_s25 = scalar_lea.sflag [#allocation5], %s1857_s29 }
 0x4ff   : > { %2635 = dma.done.wait (!%p2482_p7), %s1867_s25, 512  }
 0x500   : > { %2637 = vsyncadd (!%p2482_p7), %s1867_s25, 4294966784  ;;  %s3199_s21 = sld [smem:[#allocation11_spill]]  ;;  %s3200_s0 = sld [smem:[#allocation9_spill]] }
 0x501   : > { %s3201_s20 = sld [smem:[#allocation12_spill]]  ;;  %s3202_s18 = smov %s2644_s19 }
 0x506   : > { %p29_p8 = scmp.ge.s32.totalorder %s3199_s21, 4   ;;  %s3203_s19 = smov %s3200_s0 }
 0x508   :  { %31 = sbr.rel (!%p29_p8) target bundleno = 9 (0x9), region = 145 }
 0x50f   :  { %1872 = vsyncpa [#allocation3], 1 }
 0x510   :  { %1874 = vsyncpa [#allocation3 + $0x1], 1 }
 0x511   :  { %1875 = vsyncpa [#allocation5], 1 }
 0x512   :  { %1877 = vsyncpa [#allocation5 + $0x1], 1 }

</bundles_post_ra>
